<compile_context>
chip_gen: v7x
topology: tpu7x:2x2x1
jax: 0.10.0
libtpu: 0.0.40
codegen_flags: <defaults>
</compile_context>

<pallas_src>
import functools

import jax
import jax.numpy as jnp
import numpy as np
from jax.experimental import pallas as pl
from jax.experimental.pallas import tpu as pltpu


# -----------------------------------------------------------------------------
# Kernel: one block of TB batch elements per grid step.
#   x_ref   : (TB*S, F)   mask-scaled, pre-concatenated [context_x | context_y]
#   avg_ref : (TB, TB*S)  block-averaging matrix (grid-invariant, resident)
#   w1/b1   : encoder Linear(F -> hidden) (+ReLU)
#   wb/bb   : fused out_linear @ Wv @ out_proj @ mlp.fc1   (hidden -> 64)
#   w2/b2   : mlp.fc2 (64 -> 34)
#   out     : (TB, 34)
# -----------------------------------------------------------------------------
def deterministic_encoder_kernel(x_ref, avg_ref, w1_ref, b1_ref,
                                 wb_ref, bb_ref, w2_ref, b2_ref, out_ref):
    # encoder: ReLU(Linear(F -> hidden)) -- the only data-sized matmul
    h = jnp.maximum(
        jnp.dot(x_ref[...], w1_ref[...], preferred_element_type=jnp.float32)
        + b1_ref[...], 0.0)                                       # (TB*S, hidden) f32

    # Per-batch mean over the set dimension via the precomputed block-averaging
    # matrix (keeps everything 2-D; no per-step iota/compare/select work).
    mean_h = jnp.dot(avg_ref[...], h,
                     preferred_element_type=jnp.float32)          # (TB, hidden)

    # Uniform-softmax attention == mean(V); V/out_proj/mlp.fc1 pre-fused in the
    # wrapper into (wb, bb).
    z = jnp.maximum(
        jnp.dot(mean_h, wb_ref[...], preferred_element_type=jnp.float32)
        + bb_ref[...], 0.0)                                       # (TB, 64)
    rep = (jnp.dot(z, w2_ref[...], preferred_element_type=jnp.float32)
           + b2_ref[...])                                         # (TB, 34)

    out_ref[...] = rep.astype(out_ref.dtype)                      # single store


def _whole_spec(shape):
    zeros = (0,) * len(shape)
    return pl.BlockSpec(tuple(shape), lambda i, _z=zeros: _z)


def _pick_tb(B, S, x_itemsize):
    """Batch elements per grid step.

    Targets ~2 MiB of lane-padded x rows per block (mem/overhead-bound kernel:
    bigger DMA blocks amortize the ~0.35 us per-step pipeline overhead) while
    keeping:
      * (TB*S) % 8 == 0 or TB == B      (sublane rule on the x block)
      * TB % 8 == 0      or TB == B      (sublane rule on the (TB, E) out block)
      * grid >= 2 where possible         (v7x dual TensorCore / pipelining)
      * (TB, TB*S) f32 averaging matrix under ~4 MiB of resident VMEM
    """
    target_rows = max(8, (2 * 1024 * 1024) // (128 * x_itemsize))

    def ok(tb):
        rows = tb * S
        if rows % 8 and tb != B:
            return False
        if tb % 8 and tb != B:
            return False
        if tb * rows * 4 > 4 * 1024 * 1024:     # avg-matrix VMEM budget
            return False
        return True

    best = None
    for tb in range(1, B + 1):
        if B % tb or not ok(tb):
            continue
        if tb * S <= target_rows and B // tb >= 2:
            best = tb                            # largest valid tb w/ >=2 steps
    if best is not None:
        return best
    for tb in range(B, 0, -1):                   # fall back: largest valid tb
        if B % tb == 0 and ok(tb):
            return tb
    return B


@functools.partial(jax.jit, static_argnames=("compute_dtype",))
def deterministic_encoder(context_x, context_y, mask_matrix, target_x, params,
                          compute_dtype="bfloat16"):
    B, S, DX = context_x.shape
    DY = context_y.shape[-1]
    E = 34
    F = DX + DY
    cdt = jnp.dtype(compute_dtype)
    del target_x  # keys are a broadcast of target_x -> softmax exactly uniform
                  # -> output independent of target_x / Wq / Wk (exact algebra).

    TB = _pick_tb(B, S, cdt.itemsize)
    rows = TB * S

    # Mask folded into the concat (commutes exactly); single 2-D data stream.
    x_cat = (jnp.concatenate([context_x, context_y], axis=-1)
             * mask_matrix[..., None])
    x_cat = x_cat.reshape(B * S, F).astype(cdt)

    # Grid-invariant block-averaging matrix: row t averages rows [t*S, (t+1)*S).
    avg = (jnp.repeat(jnp.eye(TB, dtype=jnp.float32), S, axis=1)
           * (1.0 / S))                                            # (TB, TB*S)

    # ---- exact weight fusion (wrapper side, tiny matmuls) -------------------
    # out_linear -> Wv -> out_proj -> mlp.fc1 has no intermediate nonlinearity.
    w1 = params["w1"].astype(cdt)                       # (F, hidden)
    b1 = params["b1"].astype(jnp.float32)               # (1, hidden)
    w_big = (params["wo"] @ params["wv"] @ params["wp"]
             @ params["mw1"]).astype(jnp.float32)       # (hidden, 64)
    b_big = (((params["bo"] @ params["wv"] + params["bv"]) @ params["wp"]
              + params["bp"]) @ params["mw1"]
             + params["mb1"]).astype(jnp.float32)       # (1, 64)
    w2 = params["mw2"].astype(jnp.float32)              # (64, 34)
    b2 = params["mb2"].astype(jnp.float32)              # (1, 34)

    # VMEM budget (lane padding to 128 + double buffering), capped for v7x.
    x_block_bytes = rows * 128 * cdt.itemsize * 2
    avg_bytes = TB * ((rows + 127) // 128) * 128 * 4 * 2
    h_bytes = rows * 128 * 4 * 2                        # f32 intermediate slack
    vmem_limit = int(min(64 << 20,
                         max(32 << 20,
                             x_block_bytes + avg_bytes + h_bytes + (4 << 20))))

    out = pl.pallas_call(
        deterministic_encoder_kernel,
        out_shape=jax.ShapeDtypeStruct((B, E), jnp.float32),
        grid=(B // TB,),
        in_specs=[
            pl.BlockSpec((rows, F), lambda i: (i, 0)),
            pl.BlockSpec((TB, rows), lambda i: (0, 0)),   # resident, fetched once
            _whole_spec(w1.shape), _whole_spec(b1.shape),
            _whole_spec(w_big.shape), _whole_spec(b_big.shape),
            _whole_spec(w2.shape), _whole_spec(b2.shape),
        ],
        out_specs=pl.BlockSpec((TB, E), lambda i: (i, 0)),
        compiler_params=pltpu.CompilerParams(
            dimension_semantics=("parallel",),
            vmem_limit_bytes=vmem_limit),
    )(x_cat, avg, w1, b1, w_big, b_big, w2, b2)
    return out


# -----------------------------------------------------------------------------
# Pure-JAX reference: the FULL forward (masking, encoder MLP, 2-head attention
# with Q/K/V projections + softmax, out_proj, SimpleMLP, mean).  Used to prove
# the degenerate-attention / weight-fusion rewrites in the kernel are exact.
# -----------------------------------------------------------------------------
def reference(context_x, context_y, mask_matrix, target_x, params):
    B, S, _ = context_x.shape
    E, H = 34, 2
    Dh = E // H
    m = mask_matrix[..., None]
    cxm = context_x * m
    cym = context_y * m
    x = jnp.concatenate([cxm, cym], -1).reshape(B * S, -1)
    h = jax.nn.relu(x @ params["w1"] + params["b1"][0])
    out = h @ params["wo"] + params["bo"][0]
    out3 = out.reshape(B, S, E)
    tx3 = jnp.broadcast_to(target_x[:, None, :], (B, S, E))

    q = cxm @ params["wq"] + params["bq"][0]
    k = tx3 @ params["wk"] + params["bk"][0]
    v = out3 @ params["wv"] + params["bv"][0]

    qh = q.reshape(B, S, H, Dh).transpose(0, 2, 1, 3)
    kh = k.reshape(B, S, H, Dh).transpose(0, 2, 1, 3)
    vh = v.reshape(B, S, H, Dh).transpose(0, 2, 1, 3)
    s = jnp.einsum("bhqd,bhkd->bhqk", qh, kh) / (Dh ** 0.5)
    p = jax.nn.softmax(s, axis=-1)
    a = jnp.einsum("bhqk,bhkd->bhqd", p, vh)
    a = a.transpose(0, 2, 1, 3).reshape(B, S, E)
    attn_out = a @ params["wp"] + params["bp"][0]

    m1 = jax.nn.relu(attn_out @ params["mw1"] + params["mb1"][0])
    m2 = m1 @ params["mw2"] + params["mb2"][0]
    return m2.mean(axis=1)


def init_params(key, sizes, dy):
    # sizes = [DX+DY, hidden, hidden]; forward uses linears[0] then out_linear.
    E = 34
    shapes = {
        "w1": (sizes[0], sizes[1]), "b1": (1, sizes[1]),
        "wo": (sizes[1], E), "bo": (1, E),
        "wq": (E, E), "bq": (1, E),
        "wk": (E, E), "bk": (1, E),
        "wv": (E, E), "bv": (1, E),
        "wp": (E, E), "bp": (1, E),
        "mw1": (E, 64), "mb1": (1, 64),
        "mw2": (64, E), "mb2": (1, E),
    }
    params = {}
    for name, shape in sorted(shapes.items()):
        key, sub = jax.random.split(key)
        fan_in = shape[0] if len(shape) == 2 and shape[0] > 1 else 1
        params[name] = (jax.random.normal(sub, shape, jnp.float32)
                        / np.sqrt(max(fan_in, 1)))
    return params


if __name__ == "__main__":
    B, S = 16, 16         # S stands in for the hard-coded 316 of the original
    DX, DY = 34, 6        # DX fixed by attention embed_dim=34
    sizes = [DX + DY, 32, 32]

    key = jax.random.PRNGKey(0)
    k1, k2, k3, k4, kp = jax.random.split(key, 5)
    context_x = jax.random.normal(k1, (B, S, DX), jnp.float32)
    context_y = jax.random.normal(k2, (B, S, DY), jnp.float32)
    mask_matrix = (jax.random.uniform(k3, (B, S)) > 0.3).astype(jnp.float32)
    target_x = jax.random.normal(k4, (B, DX), jnp.float32)
    params = init_params(kp, sizes, DY)

    ref = reference(context_x, context_y, mask_matrix, target_x, params)

    # f32 path: proves the algebraic rewrites (uniform-softmax elimination,
    # weight fusion, mean-before-matmul, mask fold) are exact.
    out_f32 = jax.block_until_ready(
        deterministic_encoder(context_x, context_y, mask_matrix, target_x,
                              params, compute_dtype="float32"))
    np.testing.assert_allclose(np.asarray(out_f32), np.asarray(ref),
                               rtol=1e-3, atol=1e-3)

    # bf16 MXU-input path (fast path on v6e/v7x; halves the dominant HBM
    # stream on v5e), f32 accumulation.
    out_bf16 = jax.block_until_ready(
        deterministic_encoder(context_x, context_y, mask_matrix, target_x,
                              params, compute_dtype="bfloat16"))
    np.testing.assert_allclose(np.asarray(out_bf16), np.asarray(ref),
                               rtol=5e-2, atol=5e-2)

    print("KERNEL_OK")
</pallas_src>

<mosaic_0001>
module attributes {stable_mosaic.version = 11 : i64} {
  func.func @deterministic_encoder_kernel(%arg0: i32, %arg1: memref<128x40xf32, #tpu.memory_space<vmem>>, %arg2: memref<8x128xf32, #tpu.memory_space<vmem>>, %arg3: memref<40x32xf32, #tpu.memory_space<vmem>>, %arg4: memref<1x32xf32, #tpu.memory_space<vmem>>, %arg5: memref<32x64xf32, #tpu.memory_space<vmem>>, %arg6: memref<1x64xf32, #tpu.memory_space<vmem>>, %arg7: memref<64x34xf32, #tpu.memory_space<vmem>>, %arg8: memref<1x34xf32, #tpu.memory_space<vmem>>, %arg9: memref<8x34xf32, #tpu.memory_space<vmem>>) attributes {dimension_semantics = [#tpu.dimension_semantics<parallel>], iteration_bounds = array<i64: 2>, scalar_prefetch = 0 : i64, scratch_operands = 0 : i64, tpu.core_type = #tpu.core_type<tc>, window_params = [{transform_indices = @transform_0, window_bounds = array<i64: 128, 40>}, {pipeline_mode = #tpu.pipeline_mode<synchronous>, transform_indices = @transform_1, window_bounds = array<i64: 8, 128>}, {pipeline_mode = #tpu.pipeline_mode<synchronous>, transform_indices = @transform_2, window_bounds = array<i64: 40, 32>}, {pipeline_mode = #tpu.pipeline_mode<synchronous>, transform_indices = @transform_3, window_bounds = array<i64: 1, 32>}, {pipeline_mode = #tpu.pipeline_mode<synchronous>, transform_indices = @transform_4, window_bounds = array<i64: 32, 64>}, {pipeline_mode = #tpu.pipeline_mode<synchronous>, transform_indices = @transform_5, window_bounds = array<i64: 1, 64>}, {pipeline_mode = #tpu.pipeline_mode<synchronous>, transform_indices = @transform_6, window_bounds = array<i64: 64, 34>}, {pipeline_mode = #tpu.pipeline_mode<synchronous>, transform_indices = @transform_7, window_bounds = array<i64: 1, 34>}, {transform_indices = @transform_8, window_bounds = array<i64: 8, 34>}]} {
    %c0 = arith.constant 0 : index
    %c0_0 = arith.constant 0 : index
    %0 = vector.load %arg1[%c0, %c0_0] : memref<128x40xf32, #tpu.memory_space<vmem>>, vector<128x40xf32>
    %c0_1 = arith.constant 0 : index
    %c0_2 = arith.constant 0 : index
    %1 = vector.load %arg3[%c0_1, %c0_2] : memref<40x32xf32, #tpu.memory_space<vmem>>, vector<40x32xf32>
    %cst = arith.constant dense<0.000000e+00> : vector<128x32xf32>
    %2 = tpu.matmul %0, %1, %cst {dimension_numbers = #tpu.dot_dimension_numbers<[1], [0], [0], [1], [0, 0, 1, 1], [], []>} : vector<128x40xf32>, vector<40x32xf32>, vector<128x32xf32> -> vector<128x32xf32>
    %c0_3 = arith.constant 0 : index
    %c0_4 = arith.constant 0 : index
    %3 = vector.load %arg4[%c0_3, %c0_4] : memref<1x32xf32, #tpu.memory_space<vmem>>, vector<1x32xf32>
    %4 = vector.broadcast %3 : vector<1x32xf32> to vector<128x32xf32>
    %5 = arith.addf %2, %4 : vector<128x32xf32>
    %cst_5 = arith.constant 0.000000e+00 : f32
    %6 = vector.broadcast %cst_5 : f32 to vector<128x32xf32>
    %7 = arith.maximumf %5, %6 : vector<128x32xf32>
    %c0_6 = arith.constant 0 : index
    %c0_7 = arith.constant 0 : index
    %8 = vector.load %arg2[%c0_6, %c0_7] : memref<8x128xf32, #tpu.memory_space<vmem>>, vector<8x128xf32>
    %cst_8 = arith.constant dense<0.000000e+00> : vector<8x32xf32>
    %9 = tpu.matmul %8, %7, %cst_8 {dimension_numbers = #tpu.dot_dimension_numbers<[1], [0], [0], [1], [0, 0, 1, 1], [], []>} : vector<8x128xf32>, vector<128x32xf32>, vector<8x32xf32> -> vector<8x32xf32>
    %c0_9 = arith.constant 0 : index
    %c0_10 = arith.constant 0 : index
    %10 = vector.load %arg5[%c0_9, %c0_10] : memref<32x64xf32, #tpu.memory_space<vmem>>, vector<32x64xf32>
    %cst_11 = arith.constant dense<0.000000e+00> : vector<8x64xf32>
    %11 = tpu.matmul %9, %10, %cst_11 {dimension_numbers = #tpu.dot_dimension_numbers<[1], [0], [0], [1], [0, 0, 1, 1], [], []>} : vector<8x32xf32>, vector<32x64xf32>, vector<8x64xf32> -> vector<8x64xf32>
    %c0_12 = arith.constant 0 : index
    %c0_13 = arith.constant 0 : index
    %12 = vector.load %arg6[%c0_12, %c0_13] : memref<1x64xf32, #tpu.memory_space<vmem>>, vector<1x64xf32>
    %13 = vector.broadcast %12 : vector<1x64xf32> to vector<8x64xf32>
    %14 = arith.addf %11, %13 : vector<8x64xf32>
    %cst_14 = arith.constant 0.000000e+00 : f32
    %15 = vector.broadcast %cst_14 : f32 to vector<8x64xf32>
    %16 = arith.maximumf %14, %15 : vector<8x64xf32>
    %c0_15 = arith.constant 0 : index
    %c0_16 = arith.constant 0 : index
    %17 = vector.load %arg7[%c0_15, %c0_16] : memref<64x34xf32, #tpu.memory_space<vmem>>, vector<64x34xf32>
    %cst_17 = arith.constant dense<0.000000e+00> : vector<8x34xf32>
    %18 = tpu.matmul %16, %17, %cst_17 {dimension_numbers = #tpu.dot_dimension_numbers<[1], [0], [0], [1], [0, 0, 1, 1], [], []>} : vector<8x64xf32>, vector<64x34xf32>, vector<8x34xf32> -> vector<8x34xf32>
    %c0_18 = arith.constant 0 : index
    %c0_19 = arith.constant 0 : index
    %19 = vector.load %arg8[%c0_18, %c0_19] : memref<1x34xf32, #tpu.memory_space<vmem>>, vector<1x34xf32>
    %20 = vector.broadcast %19 : vector<1x34xf32> to vector<8x34xf32>
    %21 = arith.addf %18, %20 : vector<8x34xf32>
    %c0_20 = arith.constant 0 : index
    %c0_21 = arith.constant 0 : index
    %22 = vector.load %arg9[%c0_20, %c0_21] : memref<8x34xf32, #tpu.memory_space<vmem>>, vector<8x34xf32>
    tpu.vector_store %arg9[%c0_20, %c0_21], %21 {strides = array<i32>} : memref<8x34xf32, #tpu.memory_space<vmem>>, vector<8x34xf32>,
    return
  }
  func.func @transform_0(%arg0: i32) -> (i32, i32) {
    %c0_i32 = arith.constant 0 : i32
    %c0_i32_0 = arith.constant 0 : i32
    return %arg0, %c0_i32 : i32, i32
  }
  func.func @transform_1(%arg0: i32) -> (i32, i32) {
    %c0_i32 = arith.constant 0 : i32
    %c0_i32_0 = arith.constant 0 : i32
    %c0_i32_1 = arith.constant 0 : i32
    return %c0_i32, %c0_i32_0 : i32, i32
  }
  func.func @transform_2(%arg0: i32) -> (i32, i32) {
    %c0_i32 = arith.constant 0 : i32
    %c0_i32_0 = arith.constant 0 : i32
    %c0_i32_1 = arith.constant 0 : i32
    return %c0_i32, %c0_i32_0 : i32, i32
  }
  func.func @transform_3(%arg0: i32) -> (i32, i32) {
    %c0_i32 = arith.constant 0 : i32
    %c0_i32_0 = arith.constant 0 : i32
    %c0_i32_1 = arith.constant 0 : i32
    return %c0_i32, %c0_i32_0 : i32, i32
  }
  func.func @transform_4(%arg0: i32) -> (i32, i32) {
    %c0_i32 = arith.constant 0 : i32
    %c0_i32_0 = arith.constant 0 : i32
    %c0_i32_1 = arith.constant 0 : i32
    return %c0_i32, %c0_i32_0 : i32, i32
  }
  func.func @transform_5(%arg0: i32) -> (i32, i32) {
    %c0_i32 = arith.constant 0 : i32
    %c0_i32_0 = arith.constant 0 : i32
    %c0_i32_1 = arith.constant 0 : i32
    return %c0_i32, %c0_i32_0 : i32, i32
  }
  func.func @transform_6(%arg0: i32) -> (i32, i32) {
    %c0_i32 = arith.constant 0 : i32
    %c0_i32_0 = arith.constant 0 : i32
    %c0_i32_1 = arith.constant 0 : i32
    return %c0_i32, %c0_i32_0 : i32, i32
  }
  func.func @transform_7(%arg0: i32) -> (i32, i32) {
    %c0_i32 = arith.constant 0 : i32
    %c0_i32_0 = arith.constant 0 : i32
    %c0_i32_1 = arith.constant 0 : i32
    return %c0_i32, %c0_i32_0 : i32, i32
  }
  func.func @transform_8(%arg0: i32) -> (i32, i32) {
    %c0_i32 = arith.constant 0 : i32
    %c0_i32_0 = arith.constant 0 : i32
    return %arg0, %c0_i32 : i32, i32
  }
}

</mosaic_0001>

<bundles_post_ra>
// kernel: deterministic_encoder.1
= control target key start
LH: loop header
LB: loop body
LE: loop exit
PB: predicated region body
PF: predicated region fallthrough
CT: control target
= control target key end

     0   :  { %13 = vsyncpa [#allocation3], 0  ;;  %s1487_s0 = inlined_call_operand.vmem [shape: f32[256,40], index: 0, kind: input, shape index: {}]   ;;  %s1488_s1 = inlined_call_operand.vmem [shape: f32[8,128], index: 1, kind: input, shape index: {}]   ;;  %s1489_s2 = inlined_call_operand.vmem [shape: f32[40,32], index: 2, kind: input, shape index: {}]   ;;  %s1490_s3 = inlined_call_operand.vmem [shape: f32[1,32], index: 3, kind: input, shape index: {}]   ;;  %s1491_s4 = inlined_call_operand.vmem [shape: f32[32,64], index: 4, kind: input, shape index: {}]   ;;  %s1492_s5 = inlined_call_operand.vmem [shape: f32[1,64], index: 5, kind: input, shape index: {}]   ;;  %s1493_s6 = inlined_call_operand.vmem [shape: f32[64,34], index: 6, kind: input, shape index: {}]   ;;  %s1494_s7 = inlined_call_operand.vmem [shape: f32[1,34], index: 7, kind: input, shape index: {}]   ;;  %s1495_s8 = inlined_call_operand.hbm [shape: f32[16,34], index: 8, kind: output, shape index: {}]  }
   0x1   :  { %15 = vsyncpa [#allocation3 + $0x1], 0  ;;  %s1253_s27 = smov 0   ;;  %s1255_s28 = smov 0  }
   0x2   :  { %s1257_s29 = smov 0   ;;  %s1259_s30 = smov 0  }
   0x3 LB: > { %s1274_s9 = sadd.s32 4294967295, %s1202_s30   ;;  %s865_s10 = sadd.s32 4294967294, %s1202_s30   ;;  %s1202_s30 = sphi %s1259_s30, %s1501_s30   ;;  %s1198_s29 = sphi %s1257_s29, %s1500_s29   ;;  %s1194_s28 = sphi %s1255_s28, %s1499_s28   ;;  %s1190_s27 = sphi %s1253_s27, %s1498_s27  }
   0x4   : > { %s1278_s11 = sadd.s32 1, %s1202_s30   ;;  %s201_s12 = sadd.s32 1, %s1198_s29 }
   0x5   : > { %s198_s13 = ssub.s32 %s1202_s30, %s1278_s11  ;;  %p211_p0 = scmp.ne.s32.totalorder %s1198_s29, %s1194_s28 }
   0x6   : > { %p199_p1 = scmp.eq.s32.totalorder %s198_s13, 0  ;;  %p212_p2 = scmp.eq.s32.totalorder %s1274_s9, 1 }
   0x7   : > { %p217_p3 = scmp.ne.s32.totalorder %s1194_s28, %s1190_s27  ;;  %p218_p4 = scmp.eq.s32.totalorder %s865_s10, 1 }
   0x8   : > { %s1289_s14 = scalar_select %p199_p1, %s1198_s29, %s201_s12  }
   0x9   : > { %p1291_p5 = por %p212_p2, %p211_p0  ;;  %p1295_p6 = por %p218_p4, %p217_p3 }
   0xa   : > { %p868_p7 = scmp.ge.s32.totalorder %s1202_s30, 1  ;;  %p266_p8 = scmp.lt.s32.totalorder %s1202_s30, 3 }
   0xc   : > { %p267_p9 = pnand %p868_p7, %p266_p8 }
   0xd   : > { %v322_v0 = vld [vmem:[%s1489_s2] sm:$0xff] (!%p267_p9)  ;;  %v323_v1 = vld [vmem:[%s1489_s2 + $0x8] sm:$0xff] (!%p267_p9)  ;;  %v324_v2 = vld [vmem:[%s1489_s2 + $0x10] sm:$0xff] (!%p267_p9)  ;;  %s870_s23 = sshll.u32 (!%p267_p9), %s1274_s9, 4  ;;  %vm334_vm0 = vcmask (!%p267_p9), 326656   ;;  %v1204_v23 = vmov (!%p267_p9), 0.0|0.0  }
   0xe   : > { %270 = sbr.rel (%p267_p9) target bundleno = 932 (0x3a4), region = 52  ;;  %v1048_v3 = vpack.c.bf16 (!%p267_p9), %v323_v1, %v322_v0  ;;  %v325_v4 = vld [vmem:[%s1489_s2 + $0x18] sm:$0xff] (!%p267_p9)  ;;  %p301_p10 = scmp.lt.s32.totalorder (!%p267_p9), %s870_s23, 31  ;;  %v326_v6 = vld [vmem:[%s1489_s2 + $0x20] sm:$0xff] (!%p267_p9)  ;;  %1056 = vmatprep.subr.bf16.mxu1 (!%p267_p9), %v1204_v23  ;;  %vm1205_vm1 = vmmov (!%p267_p9), 0   ;;  %v1206_v24 = vmov (!%p267_p9), 0.0  }
   0xf   : > { %v1052_v5 = vpack.c.bf16 (!%p267_p9), %v325_v4, %v324_v2  ;;  %1015 = vmatprep.mubr.msk.f32.mxu1 (!%p267_p9), %vm1205_vm1, %v1206_v24  ;;  %v1363_v25 = vld [vmem:[%s1490_s3] ss:$0 sm:$0xff] (!%p267_p9)  ;;  %vm626_vm2 = vcmask (!%p267_p9), 261120   ;;  %vm716_vm3 = vcmask (!%p267_p9), 523264   ;;  %s894_s10 = sshll.u32 (!%p267_p9), %s1274_s9, 7  ;;  %vm790_vm4 = vcmask (!%p267_p9), 277504  }
  0x10   : > { %1049 = vmatprep.subr.bf16.mxu0 (!%p267_p9), %v1048_v3  ;;  %s1445_s19 = scalar_lea.hbm (!%p267_p9), %s1495_s8, %s894_s10  ;;  %s1207_s9 = smov (!%p267_p9), [#allocation2]  }
  0x11   : > { %1051 = vmatpush3.bf16.msra.mxu0 (!%p267_p9), %v1048_v3  ;;  %s1144_s22 = sshll.u32 (!%p267_p9), %s1207_s9, 4  ;;  %s1145_s22 = int_to_ptr.vmem [resolvable:$false] %s1144_s22 }
  0x12   : > { %1053 = vmatprep.subr.bf16.mxu0 (!%p267_p9), %v1052_v5 }
  0x15   : > { %s1503_s23 = smov (!%p301_p10, %s870_s23), 31  ;;  %1055 = vmatpush3.bf16.msra.mxu0 %v1052_v5 }
  0x16   : > { %s871_s26 = sshll.u32 %s1503_s23, 3  ;;  %957 = vmatprep.subr.mxu0 %v326_v6  ;;  %s297_s23 = sand.u32 1, %s1194_s28  }
  0x17   : > { %s1320_s18 = scalar_lea.vmem %s1487_s0, %s871_s26  ;;  %s869_s24 = sshll.u32 %s297_s23, 3 }
  0x18   : > { %v306_v7 = vld [vmem:[%s1320_s18] sm:$0xff]  ;;  %v307_v8 = vld [vmem:[%s1320_s18 + $0x8] sm:$0xff]  ;;  %v308_v9 = vld [vmem:[%s1320_s18 + $0x10] sm:$0xff]  ;;  %s299_s12 = scalar_lea.vmem [#allocation2], %s869_s24  ;;  %s793_s20 = scalar_lea.sflag [#allocation3], %s297_s23 }
  0x19   : > { %959 = vmatprep.mubr.msk.f32.mxu0 %vm334_vm0, %v306_v7  ;;  %958 = vmatpush3.msra.mxu0 %v326_v6  ;;  %v309_v10 = vld [vmem:[%s1320_s18 + $0x18] sm:$0xff]  ;;  %v310_v11 = vld [vmem:[%s1320_s18 + $0x20] sm:$0xff]  ;;  %v311_v12 = vld [vmem:[%s1320_s18 + $0x28] sm:$0xff]  ;;  %s806_s13 = sshll.u32 %s299_s12, 4  ;;  %s1146_s24 = scalar_lea.vmem %s1145_s22, 256  ;;  %s1447_s13 = int_to_ptr.vmem [resolvable:$true] %s806_s13 }
  0x1a   : > { %960 = vmatmul.mubr.msk.f32.vlgmr.msra.gmra.mrb[0].mxu0 %vm334_vm0, %v307_v8  ;;  %v312_v13 = vld [vmem:[%s1320_s18 + $0x30] sm:$0xff]  ;;  %v313_v14 = vld [vmem:[%s1320_s18 + $0x38] sm:$0xff]  ;;  %v314_v15 = vld [vmem:[%s1320_s18 + $0x40] sm:$0xff]  ;;  %1086 = vmatprep.subr.bf16.mxu0 %v1204_v23  ;;  %s1140_s21 = scalar_lea.vmem %s1447_s13, 128  ;;  %p1147_p0 = scmp.lt.s32.totalorder %s1447_s13, %s1145_s22 }
  0x1b   : > { %962 = vmatprep.mubr.msk.f32.mxu0 %vm334_vm0, %v308_v9  ;;  %v315_v16 = vld [vmem:[%s1320_s18 + $0x48] sm:$0xff]  ;;  %v316_v17 = vld [vmem:[%s1320_s18 + $0x50] sm:$0xff]  ;;  %v317_v18 = vld [vmem:[%s1320_s18 + $0x58] sm:$0xff]  ;;  %p1141_p11 = scmp.ne.s32.totalorder %s1447_s13, %s1140_s21  ;;  %p1148_p1 = scmp.lt.s32.totalorder %s1146_s24, %s1140_s21 }
  0x1c   : > { %v318_v19 = vld [vmem:[%s1320_s18 + $0x60] sm:$0xff]  ;;  %v319_v20 = vld [vmem:[%s1320_s18 + $0x68] sm:$0xff]  ;;  %v320_v21 = vld [vmem:[%s1320_s18 + $0x70] sm:$0xff] }
  0x1d   : > { %v321_v22 = vld [vmem:[%s1320_s18 + $0x78] sm:$0xff]  ;;  %p1142_p12 = pnand %p1141_p11, %p1291_p5  ;;  %p1149_p2 = por %p1148_p1, %p1147_p0 }
  0x1e   : > { %963 = vmatmul.mubr.msk.f32.gmra.mrb[2].mxu0 %vm334_vm0, %v309_v10 }
  0x1f   : > { %965 = vmatprep.mubr.msk.f32.mxu0 %vm334_vm0, %v310_v11  ;;  %p1143_p13 = pneg %p1142_p12 }
  0x21   : > { %p1150_p3 = pnand %p1149_p2, %p1143_p13 }
  0x22   : > { %966 = vmatmul.mubr.msk.f32.gmra.mrb[4].mxu0 %vm334_vm0, %v311_v12 }
  0x23   : > { %968 = vmatprep.mubr.msk.f32.mxu0 %vm334_vm0, %v312_v13 }
  0x26   : > { %969 = vmatmul.mubr.msk.f32.gmra.mrb[6].mxu0 %vm334_vm0, %v313_v14 }
  0x27   : > { %971 = vmatprep.mubr.msk.f32.mxu0 %vm334_vm0, %v314_v15 }
  0x2a   : > { %972 = vmatmul.mubr.msk.f32.gmra.mrb[8].mxu0 %vm334_vm0, %v315_v16 }
  0x2b   : > { %974 = vmatprep.mubr.msk.f32.mxu0 %vm334_vm0, %v316_v17  ;;  %v615_v17 = vld [vmem:[%s1491_s4] sm:$0xff] }
  0x2e   : > { %975 = vmatmul.mubr.msk.f32.gmra.mrb[10].mxu0 %vm334_vm0, %v317_v18  ;;  %v616_v18 = vld [vmem:[%s1491_s4 + $0x8] sm:$0xff] }
  0x2f   : > { %977 = vmatprep.mubr.msk.f32.mxu0 %vm334_vm0, %v318_v19 }
  0x32   : > { %978 = vmatmul.mubr.msk.f32.gmra.mrb[12].mxu0 %vm334_vm0, %v319_v20  ;;  %v544_v20 = vld [vmem:[%s1488_s1] sm:$0xff] }
  0x33   : > { %980 = vmatprep.mubr.msk.f32.mxu0 %vm334_vm0, %v320_v21  ;;  %v1081_v21 = vpack.c.bf16 %v616_v18, %v615_v17 }
  0x36   : > { %981 = vmatmul.mubr.msk.f32.gmra.mrb[14].mxu0 %vm334_vm0, %v321_v22  ;;  %v617_v22 = vld [vmem:[%s1491_s4 + $0x10] sm:$0xff] }
  0x37   : > { %1045 = vmatprep.mubr.msk.f32.mxu0 %vm1205_vm1, %v1206_v24 }
  0xed   : > { %v961_v26 = vpop.f32.mrb[0].mxu0 }
  0xee   : > { %v455_v27 = vadd.f32 %v961_v26, %v1363_v25  ;;  %v449_v28 = vpop.f32.mrb[1].mxu0 }
  0xef   : > { %v450_v29 = vadd.f32 %v1363_v25, %v449_v28  ;;  %v702_v28 = vld [vmem:[%s1493_s6 + $0x8] sm:$0xff] }
  0xf0   : > { %v529_v30 = vmax.f32 %v455_v27, 0.0  ;;  %v701_v27 = vld [vmem:[%s1493_s6] sm:$0xff] }
  0xf1   : > { %v528_v31 = vmax.f32 %v450_v29, 0.0  ;;  %v964_v32 = vpop.f32.mrb[2].mxu0  ;;  %v703_v29 = vld [vmem:[%s1493_s6 + $0x10] sm:$0xff] }
  0xf2   : > { %v465_v33 = vadd.f32 %v964_v32, %v1363_v25  ;;  %v459_v34 = vpop.f32.mrb[3].mxu0  ;;  %v705_v32 = vld [vmem:[%s1493_s6 + $0x20] sm:$0xff] }
  0xf3   : > { %v460_v35 = vadd.f32 %v1363_v25, %v459_v34  ;;  %v1057_v36 = vpack.c.bf16 %v529_v30, %v528_v31  ;;  %v1087_v30 = vpack.c.bf16 %v702_v28, %v701_v27 }
  0xf4   : > { %v531_v37 = vmax.f32 %v465_v33, 0.0  ;;  %v706_v33 = vld [vmem:[%s1493_s6 + $0x28] sm:$0xff] }
  0xf5   : > { %v530_v38 = vmax.f32 %v460_v35, 0.0  ;;  %v967_v39 = vpop.f32.mrb[4].mxu0  ;;  %1058 = vmatpush3.bf16.msra.mxu1 %v1057_v36  ;;  %1088 = vmatpush3.bf16.msra.mxu0 %v1087_v30  ;;  %v1093_v34 = vpack.c.bf16 %v706_v33, %v705_v32  ;;  %v707_v35 = vld [vmem:[%s1493_s6 + $0x30] sm:$0xff]  ;;  %v708_v36 = vld [vmem:[%s1493_s6 + $0x38] sm:$0xff] }
  0xf6   : > { %v475_v40 = vadd.f32 %v967_v39, %v1363_v25  ;;  %v469_v41 = vpop.f32.mrb[5].mxu0  ;;  %1059 = vmatprep.subr.bf16.mxu1 %v1204_v23  ;;  %1089 = vmatprep.subr.bf16.mxu0 %v1204_v23 }
  0xf7   : > { %v1060_v42 = vpack.c.bf16 %v531_v37, %v530_v38  ;;  %v470_v43 = vadd.f32 %v1363_v25, %v469_v41  ;;  %v1096_v37 = vpack.c.bf16 %v708_v36, %v707_v35 }
  0xf8   : > { %v533_v44 = vmax.f32 %v475_v40, 0.0  ;;  %v889_v40 = vld [vmem:[%s1492_s5] ss:$0 sm:$0xff] }
  0xf9   : > { %v532_v45 = vmax.f32 %v470_v43, 0.0  ;;  %v970_v46 = vpop.f32.mrb[6].mxu0  ;;  %1061 = vmatpush3.bf16.msra.mxu1 %v1060_v42 }
  0xfa   : > { %v485_v47 = vadd.f32 %v970_v46, %v1363_v25  ;;  %v479_v48 = vpop.f32.mrb[7].mxu0  ;;  %1062 = vmatprep.subr.bf16.mxu1 %v1204_v23 }
  0xfb   : > { %v1063_v49 = vpack.c.bf16 %v533_v44, %v532_v45  ;;  %v480_v50 = vadd.f32 %v1363_v25, %v479_v48 }
  0xfc   : > { %v535_v51 = vmax.f32 %v485_v47, 0.0 }
  0xfd   : > { %v534_v52 = vmax.f32 %v480_v50, 0.0  ;;  %v973_v53 = vpop.f32.mrb[8].mxu0  ;;  %1064 = vmatpush3.bf16.msra.mxu1 %v1063_v49 }
  0xfe   : > { %v495_v54 = vadd.f32 %v973_v53, %v1363_v25  ;;  %v489_v55 = vpop.f32.mrb[9].mxu0  ;;  %1065 = vmatprep.subr.bf16.mxu1 %v1204_v23 }
  0xff   : > { %v1066_v56 = vpack.c.bf16 %v535_v51, %v534_v52  ;;  %v490_v57 = vadd.f32 %v1363_v25, %v489_v55 }
 0x100   : > { %v537_v58 = vmax.f32 %v495_v54, 0.0 }
 0x101   : > { %v536_v59 = vmax.f32 %v490_v57, 0.0  ;;  %v976_v60 = vpop.f32.mrb[10].mxu0  ;;  %1067 = vmatpush3.bf16.msra.mxu1 %v1066_v56 }
 0x102   : > { %v505_v61 = vadd.f32 %v976_v60, %v1363_v25  ;;  %v499_v62 = vpop.f32.mrb[11].mxu0  ;;  %1068 = vmatprep.subr.bf16.mxu1 %v1204_v23 }
 0x103   : > { %v1069_v63 = vpack.c.bf16 %v537_v58, %v536_v59  ;;  %v500_v0 = vadd.f32 %v1363_v25, %v499_v62 }
 0x104   : > { %v539_v1 = vmax.f32 %v505_v61, 0.0 }
 0x105   : > { %v538_v2 = vmax.f32 %v500_v0, 0.0  ;;  %v979_v3 = vpop.f32.mrb[12].mxu0  ;;  %1070 = vmatpush3.bf16.msra.mxu1 %v1069_v63 }
 0x106   : > { %v515_v4 = vadd.f32 %v979_v3, %v1363_v25  ;;  %v509_v5 = vpop.f32.mrb[13].mxu0  ;;  %1071 = vmatprep.subr.bf16.mxu1 %v1204_v23 }
 0x107   : > { %v1072_v6 = vpack.c.bf16 %v539_v1, %v538_v2  ;;  %v510_v7 = vadd.f32 %v1363_v25, %v509_v5 }
 0x108   : > { %v541_v8 = vmax.f32 %v515_v4, 0.0 }
 0x109   : > { %v540_v9 = vmax.f32 %v510_v7, 0.0  ;;  %v982_v10 = vpop.f32.mrb[14].mxu0  ;;  %1073 = vmatpush3.bf16.msra.mxu1 %v1072_v6 }
 0x10a   : > { %v525_v11 = vadd.f32 %v982_v10, %v1363_v25  ;;  %v519_v12 = vpop.f32.mrb[15].mxu0  ;;  %1074 = vmatprep.subr.bf16.mxu1 %v1204_v23 }
 0x10b   : > { %v1075_v13 = vpack.c.bf16 %v541_v8, %v540_v9  ;;  %v520_v14 = vadd.f32 %v1363_v25, %v519_v12  ;;  %v618_v25 = vld [vmem:[%s1491_s4 + $0x18] sm:$0xff] }
 0x10c   : > { %v543_v15 = vmax.f32 %v525_v11, 0.0  ;;  %v1084_v26 = vpack.c.bf16 %v618_v25, %v617_v22 }
 0x10d   : > { %v542_v16 = vmax.f32 %v520_v14, 0.0  ;;  %1076 = vmatpush3.bf16.msra.mxu1 %v1075_v13 }
 0x10e   : > { %1077 = vmatprep.subr.bf16.mxu1 %v1204_v23 }
 0x10f   : > { %v1078_v19 = vpack.c.bf16 %v543_v15, %v542_v16 }
 0x111   : > { %1079 = vmatpush3.bf16.msra.mxu1 %v1078_v19 }
 0x112   : > { %1080 = vmatprep.subr.bf16.mxu1 %v1204_v23 }
 0x114   : > { %1016 = vmatmul.mubr.f32.vlgmr.msra.gmra.mrb[0].mxu1 %v544_v20 }
 0x115   : > { %1082 = vmatpush3.bf16.msra.mxu1 %v1081_v21  ;;  %1026 = vmatprep.mubr.msk.f32.mxu1 %vm1205_vm1, %v1206_v24  ;;  %v704_v24 = vld [vmem:[%s1493_s6 + $0x18] sm:$0xff] }
 0x116   : > { %1083 = vmatprep.subr.bf16.mxu1 %v1204_v23  ;;  %v1090_v31 = vpack.c.bf16 %v704_v24, %v703_v29 }
 0x118   : > { %1091 = vmatpush3.bf16.msra.mxu0 %v1090_v31 }
 0x119   : > { %1085 = vmatpush3.bf16.msra.mxu1 %v1084_v26  ;;  %1092 = vmatprep.subr.bf16.mxu0 %v1204_v23 }
 0x11c   : > { %1094 = vmatpush3.bf16.msra.mxu0 %v1093_v34 }
 0x11d   : > { %1095 = vmatprep.subr.bf16.mxu0 %v1204_v23  ;;  %v891_v23 = vld [vmem:[%s1494_s7] ss:$0 sm:$0xff] }
 0x120   : > { %1097 = vmatpush3.bf16.msra.mxu0 %v1096_v37 }
 0x1e7   : > { %v611_v38 = vpop.f32.mrb[0].mxu1 }
 0x1e8   : > { %v1017_v39 = vpop.f32.mrb[1].mxu1  ;;  %1027 = vmatmul.mubr.msk.f32.vlgmr.msra.gmra.mrb[2].mxu1 %vm626_vm2, %v611_v38 }
 0x2bb   : > { %v696_v41 = vpop.f32.mrb[2].mxu1 }
 0x2bc   : > { %v697_v42 = vadd.f32 %v889_v40, %v696_v41  ;;  %v1028_v43 = vpop.f32.mrb[3].mxu1 }
 0x2be   : > { %v700_v44 = vmax.f32 %v697_v42, 0.0 }
 0x2c0   : > { %1046 = vmatmul.mubr.msk.f32.vlgmr.msra.gmra.mrb[16].mxu0 %vm716_vm3, %v700_v44 }
 0x393   : > { %v786_v45 = vpop.f32.mrb[16].mxu0 }
 0x394   : > { %v787_v46 = vadd.f32 %v891_v23, %v786_v45  ;;  %v1047_v47 = vpop.f32.mrb[17].mxu0 }
 0x396   : > { %791 = vst.msk [vmem:[%s299_s12] sm:$0xff] %vm790_vm4, %v787_v46 }
 0x397   : > { %1153 = shalt.err (!%p1150_p3)
}
 0x398   : > { %s1154_s23 = scalar_lea.hbm %s1445_s19, 128  ;;  %s1158_s10 = scalar_lea.hbm %s1495_s8, 256 }
 0x399   : > { %p1155_p4 = scmp.ne.s32.totalorder %s1445_s19, %s1154_s23  ;;  %p1159_p9 = scmp.lt.u32.totalorder %s1445_s19, %s1495_s8 }
 0x39a   : > { %p1160_p10 = scmp.lt.u32.totalorder %s1158_s10, %s1154_s23  ;;  %p1162_p12 = scmp.lt.u32.totalorder %s1154_s23, %s1445_s19 }
 0x39b   : > { %p1156_p7 = pnand %p1155_p4, %p1291_p5 }
 0x39c   : > { %p1161_p11 = por %p1160_p10, %p1159_p9 }
 0x39d   : > { %p1157_p8 = pneg %p1156_p7 }
 0x39e   : > { %p1163_p13 = por %p1162_p12, %p1161_p11 }
 0x3a0   : > { %p1164_p0 = pnand %p1163_p13, %p1157_p8 }
 0x3a2   : > { %1167 = shalt.err (!%p1164_p0)
}
 0x3a3   : > { %1098 = dma.vmem_to_hbm [thread:$0]  (%p1291_p5), %s1447_s13, 128, %s1445_s19, %s793_s20  }
 0x3a4 PF: > { %p1104_p1 = scmp.ge.s32.totalorder %s1202_s30, 2  ;;  %s818_s18 = sand.u32 1, %s1190_s27  }
 0x3a5   : > { %s819_s21 = scalar_lea.sflag [#allocation3], %s818_s18 }
 0x3a6   : > { %p1101_p2 = pnand %p1104_p1, %p1295_p6 }
 0x3a8   : > { %1185 = dma.done.wait (!%p1101_p2), %s819_s21, 128  }
 0x3a9   : > { %1187 = vsyncadd (!%p1101_p2), %s819_s21, 4294967168  ;;  %p18_p3 = scmp.ge.s32.totalorder %s1278_s11, 4   ;;  %s1498_s27 = smov %s1194_s28 }
 0x3aa   : > { %s1499_s28 = smov %s1198_s29  ;;  %s1500_s29 = smov %s1289_s14 }
 0x3ab   : > { %s1501_s30 = smov %s1278_s11  ;;  %20 = sbr.rel (!%p18_p3) target bundleno = 3 (0x3), region = 87 }
 0x3b2   :  { %824 = vsyncpa [#allocation3], 1 }
 0x3b3   :  { %826 = vsyncpa [#allocation3 + $0x1], 1 }

</bundles_post_ra>
